<compile_context>
chip_gen: v5e
topology: v5e:2x2
jax: 0.10.0
libtpu: 0.0.40
codegen_flags: <defaults>
</compile_context>

<pallas_src>
import functools

import jax
import jax.numpy as jnp
from jax.experimental import pallas as pl
from jax.experimental.pallas import tpu as pltpu

EPS = 1e-5                 # torch.nn.LayerNorm default
_MAX_ROW_TILE = 1024       # mem-bound sweet spot; the VMEM budget caps it on v7x
_FALLBACK_VMEM = 64 << 20  # v7x per-core VMEM (most conservative generation)


def add_norm_kernel(x_ref, y_ref, gamma_ref, beta_ref, o_ref, *, h_valid, h_pad):
    """x/y/o: (ROW_TILE, H_PAD); gamma/beta: (1, H_PAD) f32."""
    # Residual add in the input dtype; single upcast for the f32 statistics.
    z = (x_ref[...] + y_ref[...]).astype(jnp.float32)

    # Two-pass (centered) LayerNorm statistics — matches torch's formulation
    # and avoids the E[z^2] - E[z]^2 cancellation/precision issue.
    inv_h = 1.0 / h_valid
    mean = jnp.sum(z, axis=-1, keepdims=True) * inv_h
    centered = z - mean
    sq = centered * centered
    if h_pad != h_valid:
        # Zero-padded hidden columns hold -mean after centering; mask them out
        # of the variance. Compile-time branch: zero cost when h % 128 == 0.
        col = jax.lax.broadcasted_iota(jnp.int32, (1, h_pad), 1)
        sq = jnp.where(col < h_valid, sq, 0.0)
    var = jnp.sum(sq, axis=-1, keepdims=True) * inv_h
    inv = jax.lax.rsqrt(var + EPS)

    # NOTE: if a bundle dump ever shows the XLU/vst slot (not DMA) binding on
    # v7x, the row sums could be offloaded to the idle MXU (jnp.dot with a
    # ones vector); on v5e/v6e the kernel stays DMA-bound so keep it simple.
    o_ref[...] = (centered * inv * gamma_ref[...] + beta_ref[...]).astype(o_ref.dtype)


def _round_up(v, m):
    return ((v + m - 1) // m) * m


def _tpu_info():
    """Returns (per-core VMEM bytes, TensorCores per chip) with safe fallbacks."""
    try:
        info = pltpu.get_tpu_info()
        vmem = int(info.vmem_capacity_bytes)
    except Exception:
        return _FALLBACK_VMEM, 1
    cores = 1
    for attr in ("num_cores", "cores_per_chip", "num_tensorcores",
                 "tensorcores_per_chip", "core_count"):
        v = getattr(info, attr, None)
        if isinstance(v, int) and v > 0:
            cores = v
            break
    return vmem, cores


def _pick_row_tile(rows, h_pad, dtype_bytes, requested, budget, cores):
    # Sublane packing: f32 -> 8 rows per tile, bf16/f16 -> 16, int8/fp8 -> 32.
    row_align = 8 if dtype_bytes >= 4 else (16 if dtype_bytes == 2 else 32)
    if requested is not None:
        tile = max(row_align, _round_up(requested, row_align))
        return min(tile, max(row_align, _round_up(rows, row_align)))

    # Per-row VMEM: (x, y, out) blocks double-buffered + ~4 rows of f32 temps.
    per_row = 6 * h_pad * dtype_bytes + 4 * h_pad * 4
    fixed = 4 * h_pad * 4  # gamma/beta (f32, double-buffered)
    tile = max(row_align, ((budget - fixed) // per_row) // row_align * row_align)
    tile = min(tile, _MAX_ROW_TILE)
    tile = min(tile, max(row_align, _round_up(rows, row_align)))

    # Megacore (v7x): keep an even (>=2) number of grid steps so both
    # TensorCores get equal work; skipped on single-core chips where the extra
    # step is pure serial-loop overhead.
    if cores >= 2 and rows >= 2 * row_align:
        steps = pl.cdiv(rows, tile)
        if steps < 2 or steps % 2:
            steps = max(2, steps + (steps % 2))
            tile = max(row_align, _round_up(pl.cdiv(rows, steps), row_align))
    return tile


def add_norm(x, y, gamma, beta, *, row_tile=None):
    """x, y: (batch, seq, hidden); gamma, beta: (hidden,)."""
    assert x.shape == y.shape
    b, s, h = x.shape
    rows = b * s
    dtype_bytes = jnp.dtype(x.dtype).itemsize

    # Lane-dense hidden dim: pad to a multiple of 128 only when required
    # (no-op for real transformer hidden sizes).
    h_pad = h if h % 128 == 0 else _round_up(h, 128)

    vmem_cap, cores = _tpu_info()
    budget = int(0.8 * vmem_cap)
    tile = _pick_row_tile(rows, h_pad, dtype_bytes, row_tile, budget, cores)

    x2 = x.reshape(rows, h)
    y2 = y.reshape(rows, h)
    # Pre-cast affine params to f32 once; avoids per-step casts in the body.
    g2 = gamma.astype(jnp.float32).reshape(1, h)
    b2 = beta.astype(jnp.float32).reshape(1, h)
    if h_pad != h:
        hp = ((0, 0), (0, h_pad - h))
        x2 = jnp.pad(x2, hp)
        y2 = jnp.pad(y2, hp)
        g2 = jnp.pad(g2, hp)
        b2 = jnp.pad(b2, hp)

    grid = (pl.cdiv(rows, tile),)

    cost = pl.CostEstimate(
        flops=8 * rows * h_pad,
        transcendentals=rows,
        bytes_accessed=3 * rows * h_pad * dtype_bytes + 2 * h_pad * 4,
    )

    kernel = functools.partial(add_norm_kernel, h_valid=h, h_pad=h_pad)

    out = pl.pallas_call(
        kernel,
        out_shape=jax.ShapeDtypeStruct((rows, h_pad), x.dtype),
        grid_spec=pltpu.PrefetchScalarGridSpec(
            num_scalar_prefetch=0,
            grid=grid,
            in_specs=[
                pl.BlockSpec((tile, h_pad), lambda i: (i, 0)),
                pl.BlockSpec((tile, h_pad), lambda i: (i, 0)),
                pl.BlockSpec((1, h_pad), lambda i: (0, 0)),
                pl.BlockSpec((1, h_pad), lambda i: (0, 0)),
            ],
            out_specs=pl.BlockSpec((tile, h_pad), lambda i: (i, 0)),
        ),
        compiler_params=pltpu.CompilerParams(
            dimension_semantics=("parallel",),
            vmem_limit_bytes=int(max(budget, 32 << 20)),
        ),
        cost_estimate=cost,
    )(x2, y2, g2, b2)

    if h_pad != h:
        out = out[:, :h]
    return out.reshape(b, s, h)


def add_norm_ref(x, y, gamma, beta):
    z = (y + x).astype(jnp.float32)
    mean = jnp.mean(z, axis=-1, keepdims=True)
    var = jnp.mean((z - mean) ** 2, axis=-1, keepdims=True)
    normed = (z - mean) / jnp.sqrt(var + EPS)
    return (normed * gamma + beta).astype(x.dtype)


if __name__ == "__main__":
    key = jax.random.PRNGKey(0)
    kx, ky, kg, kb = jax.random.split(key, 4)

    # Primary case: batch=2, seq=8, hidden=32, f32 (small, deterministic).
    batch, seq, hidden = 2, 8, 32
    x = jax.random.normal(kx, (batch, seq, hidden), dtype=jnp.float32)
    y = jax.random.normal(ky, (batch, seq, hidden), dtype=jnp.float32)
    gamma = jax.random.normal(kg, (hidden,), dtype=jnp.float32) * 0.1 + 1.0
    beta = jax.random.normal(kb, (hidden,), dtype=jnp.float32) * 0.1

    out = jax.block_until_ready(add_norm(x, y, gamma, beta))
    ref = add_norm_ref(x, y, gamma, beta)
    assert out.shape == (batch, seq, hidden)
    assert jnp.allclose(out, ref, atol=1e-4, rtol=1e-4)

    # Ragged rows (rows % tile != 0): exercises the masked last grid block.
    xr = jax.random.normal(kx, (3, 5, hidden), dtype=jnp.float32)
    yr = jax.random.normal(ky, (3, 5, hidden), dtype=jnp.float32)
    outr = jax.block_until_ready(add_norm(xr, yr, gamma, beta, row_tile=8))
    refr = add_norm_ref(xr, yr, gamma, beta)
    assert jnp.allclose(outr, refr, atol=1e-4, rtol=1e-4)

    # bf16 inputs with a lane-aligned hidden dim (no padding path at all).
    hb = 256
    xb = jax.random.normal(kx, (2, 16, hb), dtype=jnp.bfloat16)
    yb = jax.random.normal(ky, (2, 16, hb), dtype=jnp.bfloat16)
    gb = jnp.ones((hb,), dtype=jnp.float32)
    bb = jnp.zeros((hb,), dtype=jnp.float32)
    outb = jax.block_until_ready(add_norm(xb, yb, gb, bb))
    refb = add_norm_ref(xb, yb, gb, bb)
    assert jnp.allclose(outb.astype(jnp.float32), refb.astype(jnp.float32),
                        atol=5e-2, rtol=5e-2)

    print("KERNEL_OK")
</pallas_src>

<mosaic_0001>
module attributes {stable_mosaic.version = 11 : i64} {
  func.func @add_norm_kernel(%arg0: i32, %arg1: memref<16x128xf32, #tpu.memory_space<vmem>>, %arg2: memref<16x128xf32, #tpu.memory_space<vmem>>, %arg3: memref<1x128xf32, #tpu.memory_space<vmem>>, %arg4: memref<1x128xf32, #tpu.memory_space<vmem>>, %arg5: memref<16x128xf32, #tpu.memory_space<vmem>>) attributes {dimension_semantics = [#tpu.dimension_semantics<parallel>], iteration_bounds = array<i64: 1>, scalar_prefetch = 0 : i64, scratch_operands = 0 : i64, tpu.core_type = #tpu.core_type<tc>, window_params = [{transform_indices = @transform_0, window_bounds = array<i64: 16, 128>}, {transform_indices = @transform_1, window_bounds = array<i64: 16, 128>}, {pipeline_mode = #tpu.pipeline_mode<synchronous>, transform_indices = @transform_2, window_bounds = array<i64: 1, 128>}, {pipeline_mode = #tpu.pipeline_mode<synchronous>, transform_indices = @transform_3, window_bounds = array<i64: 1, 128>}, {transform_indices = @transform_4, window_bounds = array<i64: 16, 128>}]} {
    %c0 = arith.constant 0 : index
    %c0_0 = arith.constant 0 : index
    %0 = vector.load %arg1[%c0, %c0_0] : memref<16x128xf32, #tpu.memory_space<vmem>>, vector<16x128xf32>
    %c0_1 = arith.constant 0 : index
    %c0_2 = arith.constant 0 : index
    %1 = vector.load %arg2[%c0_1, %c0_2] : memref<16x128xf32, #tpu.memory_space<vmem>>, vector<16x128xf32>
    %2 = arith.addf %0, %1 : vector<16x128xf32>
    %cst = arith.constant dense<0.000000e+00> : vector<16xf32>
    %3 = vector.multi_reduction <add>, %2, %cst [1] : vector<16x128xf32> to vector<16xf32>
    %4 = vector.shape_cast %3 : vector<16xf32> to vector<16x1xf32>
    %cst_3 = arith.constant 3.125000e-02 : f32
    %5 = vector.broadcast %cst_3 : f32 to vector<16x1xf32>
    %6 = arith.mulf %4, %5 : vector<16x1xf32>
    %7 = vector.broadcast %6 : vector<16x1xf32> to vector<16x128xf32>
    %8 = arith.subf %2, %7 : vector<16x128xf32>
    %9 = arith.mulf %8, %8 : vector<16x128xf32>
    %10 = tpu.iota {dimensions = array<i32: 1>} : vector<1x128xi32>
    %c32_i32 = arith.constant 32 : i32
    %11 = vector.broadcast %c32_i32 : i32 to vector<1x128xi32>
    %12 = arith.cmpi slt, %10, %11 : vector<1x128xi32>
    %cst_4 = arith.constant 0.000000e+00 : f32
    %13 = vector.shape_cast %12 : vector<1x128xi1> to vector<1x128xi1>
    %14 = vector.broadcast %13 : vector<1x128xi1> to vector<16x128xi1>
    %15 = vector.broadcast %cst_4 : f32 to vector<16x128xf32>
    %16 = arith.select %14, %9, %15 : vector<16x128xi1>, vector<16x128xf32>
    %cst_5 = arith.constant dense<0.000000e+00> : vector<16xf32>
    %17 = vector.multi_reduction <add>, %16, %cst_5 [1] : vector<16x128xf32> to vector<16xf32>
    %18 = vector.shape_cast %17 : vector<16xf32> to vector<16x1xf32>
    %cst_6 = arith.constant 3.125000e-02 : f32
    %19 = vector.broadcast %cst_6 : f32 to vector<16x1xf32>
    %20 = arith.mulf %18, %19 : vector<16x1xf32>
    %cst_7 = arith.constant 9.99999974E-6 : f32
    %21 = vector.broadcast %cst_7 : f32 to vector<16x1xf32>
    %22 = arith.addf %20, %21 : vector<16x1xf32>
    %23 = math.rsqrt %22 : vector<16x1xf32>
    %24 = vector.broadcast %23 : vector<16x1xf32> to vector<16x128xf32>
    %25 = arith.mulf %8, %24 : vector<16x128xf32>
    %c0_8 = arith.constant 0 : index
    %c0_9 = arith.constant 0 : index
    %26 = vector.load %arg3[%c0_8, %c0_9] : memref<1x128xf32, #tpu.memory_space<vmem>>, vector<1x128xf32>
    %27 = vector.broadcast %26 : vector<1x128xf32> to vector<16x128xf32>
    %28 = arith.mulf %25, %27 : vector<16x128xf32>
    %c0_10 = arith.constant 0 : index
    %c0_11 = arith.constant 0 : index
    %29 = vector.load %arg4[%c0_10, %c0_11] : memref<1x128xf32, #tpu.memory_space<vmem>>, vector<1x128xf32>
    %30 = vector.broadcast %29 : vector<1x128xf32> to vector<16x128xf32>
    %31 = arith.addf %28, %30 : vector<16x128xf32>
    %c0_12 = arith.constant 0 : index
    %c0_13 = arith.constant 0 : index
    %32 = vector.load %arg5[%c0_12, %c0_13] : memref<16x128xf32, #tpu.memory_space<vmem>>, vector<16x128xf32>
    tpu.vector_store %arg5[%c0_12, %c0_13], %31 {strides = array<i32>} : memref<16x128xf32, #tpu.memory_space<vmem>>, vector<16x128xf32>,
    return
  }
  func.func @transform_0(%arg0: i32) -> (i32, i32) {
    %c0_i32 = arith.constant 0 : i32
    %c0_i32_0 = arith.constant 0 : i32
    return %arg0, %c0_i32 : i32, i32
  }
  func.func @transform_1(%arg0: i32) -> (i32, i32) {
    %c0_i32 = arith.constant 0 : i32
    %c0_i32_0 = arith.constant 0 : i32
    return %arg0, %c0_i32 : i32, i32
  }
  func.func @transform_2(%arg0: i32) -> (i32, i32) {
    %c0_i32 = arith.constant 0 : i32
    %c0_i32_0 = arith.constant 0 : i32
    %c0_i32_1 = arith.constant 0 : i32
    return %c0_i32, %c0_i32_0 : i32, i32
  }
  func.func @transform_3(%arg0: i32) -> (i32, i32) {
    %c0_i32 = arith.constant 0 : i32
    %c0_i32_0 = arith.constant 0 : i32
    %c0_i32_1 = arith.constant 0 : i32
    return %c0_i32, %c0_i32_0 : i32, i32
  }
  func.func @transform_4(%arg0: i32) -> (i32, i32) {
    %c0_i32 = arith.constant 0 : i32
    %c0_i32_0 = arith.constant 0 : i32
    return %arg0, %c0_i32 : i32, i32
  }
}

</mosaic_0001>

<bundles_post_ra>
// kernel: tpu_custom_call.1
= control target key start
LH: loop header
LB: loop body
LE: loop exit
PB: predicated region body
PF: predicated region fallthrough
CT: control target
= control target key end

     0   :  { %9 = vsyncpa [#allocation3], 0  ;;  %s280_s0 = inlined_call_operand.hbm [shape: f32[16,128], index: 0, kind: input, shape index: {}]   ;;  %s281_s1 = inlined_call_operand.hbm [shape: f32[16,128], index: 1, kind: input, shape index: {}]   ;;  %s282_s2 = inlined_call_operand.vmem [shape: f32[1,128], index: 2, kind: input, shape index: {}]   ;;  %s283_s3 = inlined_call_operand.vmem [shape: f32[1,128], index: 3, kind: input, shape index: {}]   ;;  %s284_s4 = inlined_call_operand.hbm [shape: f32[16,128], index: 4, kind: output, shape index: {}]  }
   0x1   :  { %10 = vsyncpa [#allocation6], 0 }
   0x2   :  { %11 = vsyncpa [#allocation4], 0  ;;  %s16_s17 = sshll.u32 %s280_s0, 4  ;;  %s226_s18 = smov [#allocation2]   ;;  %s17_s17 = int_to_ptr.hbm [resolvable:$true] %s16_s17 }
   0x3   :  { %s18_s19 = sshll.u32 %s226_s18, 4  ;;  %s29_s22 = sshll.u32 %s281_s1, 4  ;;  %s19_s19 = int_to_ptr.vmem [resolvable:$true] %s18_s19  ;;  %s30_s22 = int_to_ptr.hbm [resolvable:$true] %s29_s22 }
   0x4   :  { %s227_s23 = smov 128   ;;  %s228_s24 = smov 8  }
   0x5   :  { %24 = dma.hbm_to_vmem [thread:$0]  %s17_s17, 256, %s19_s19, [#allocation3], %s227_s23, %s227_s23, %s228_s24  }
   0x6   :  { %s229_s25 = smov [#allocation5]  }
   0x7   :  { %s31_s26 = sshll.u32 %s229_s25, 4  ;;  %s32_s26 = int_to_ptr.vmem [resolvable:$true] %s31_s26 }
   0x8   :  { %37 = dma.hbm_to_vmem [thread:$0]  %s30_s22, 256, %s32_s26, [#allocation6], %s227_s23, %s227_s23, %s228_s24  }
   0x9   :  { %220 = dma.done.wait [#allocation3], 256  }
   0xa   :  { %221 = vsyncadd [#allocation3], 4294967040 }
   0xb   :  { %222 = dma.done.wait [#allocation6], 256  }
   0xc   :  { %223 = vsyncadd [#allocation6], 4294967040  ;;  %v50_v0 = vld [vmem:[#allocation2] sm:$0xff]  ;;  %v52_v1 = vld [vmem:[#allocation5] sm:$0xff]  ;;  %v66_v6 = vlaneseq  ;;  %s230_s29 = smov [#allocation7]   ;;  %s123_s6 = sshll.u32 %s284_s4, 4  ;;  %s124_s6 = int_to_ptr.hbm [resolvable:$true] %s123_s6 }
   0xd   :  { %v54_v2 = vadd.f32 %v52_v1, %v50_v0  ;;  %v51_v3 = vld [vmem:[#allocation2 + $0x8] sm:$0xff]  ;;  %v53_v4 = vld [vmem:[#allocation5 + $0x8] sm:$0xff]  ;;  %v142_v32 = vld [vmem:[%s282_s2] ss:$0 sm:$0xff]  ;;  %s121_s2 = sshll.u32 %s230_s29, 4  ;;  %s122_s2 = int_to_ptr.vmem [resolvable:$true] %s121_s2 }
   0xe   :  { %v55_v5 = vadd.f32 %v53_v4, %v51_v3  ;;  %v67_v8 = vand.u32 127, %v66_v6  ;;  %v143_v36 = vld [vmem:[%s283_s3] ss:$0 sm:$0xff] }
   0xf   :  { %56 = vadd.xlane.f32.xlu0 %v54_v2 }
  0x10   :  { %vm68_vm0 = vcmp.lt.s32.totalorder %v67_v8, 32 }
  0x17   :  { %58 = vadd.xlane.f32.xlu0 %v55_v5 }
  0x82   :  { %v57_v7 = vpop.xlane.xlu0 %56 }
  0x83   :  { %v60_v9 = vmul.f32 0.03125, %v57_v7 }
  0x85   :  { %v62_v10 = vsub.f32 %v54_v2, %v60_v9 }
  0x87   :  { %v64_v11 = vmul.f32 %v62_v10, %v62_v10 }
  0x89   :  { %v71_v12 = vsel %vm68_vm0, %v64_v11, 0.0 }
  0x8a   :  { %73 = vadd.xlane.f32.xlu1 %v71_v12  ;;  %v59_v13 = vpop.xlane.xlu0 %58 }
  0x8b   :  { %v61_v14 = vmul.f32 0.03125, %v59_v13 }
  0x8d   :  { %v63_v15 = vsub.f32 %v55_v5, %v61_v14 }
  0x8f   :  { %v65_v16 = vmul.f32 %v63_v15, %v63_v15 }
  0x91   :  { %v72_v17 = vsel %vm68_vm0, %v65_v16, 0.0 }
  0x92   :  { %75 = vadd.xlane.f32.xlu1 %v72_v17 }
  0xfd   :  { %v74_v18 = vpop.xlane.xlu1 %73 }
  0xfe   :  { %v77_v19 = vmul.f32 0.03125, %v74_v18 }
 0x100   :  { %v79_v20 = vadd.f32 1e-05, %v77_v19 }
 0x102   :  { %144 = vrsqrt.f32 %v79_v20  ;;  %vm87_vm2 = vweird.f32 %v79_v20 }
 0x105   :  { %v76_v21 = vpop.xlane.xlu1 %75 }
 0x106   :  { %v78_v22 = vmul.f32 0.03125, %v76_v21 }
 0x108   :  { %v145_v23 = vpop.eup %144  ;;  %v80_v24 = vadd.f32 1e-05, %v78_v22 }
 0x109   :  { %v82_v25 = vmul.f32 %v145_v23, %v79_v20  ;;  %vm88_vm1 = vweird.f32 %v145_v23 }
 0x10a   :  { %146 = vrsqrt.f32 %v80_v24  ;;  %vm89_vm3 = vmor %vm87_vm2, %vm88_vm1  ;;  %vm97_vm5 = vweird.f32 %v80_v24 }
 0x10b   :  { %v83_v26 = vmul.f32 %v145_v23, %v82_v25 }
 0x10d   :  { %v84_v27 = vmul.f32 0.5, %v83_v26 }
 0x10f   :  { %v85_v28 = vsub.f32 1.5, %v84_v27 }
 0x110   :  { %v147_v29 = vpop.eup %146 }
 0x111   :  { %v86_v30 = vmul.f32 %v145_v23, %v85_v28  ;;  %v92_v31 = vmul.f32 %v147_v29, %v80_v24  ;;  %vm98_vm4 = vweird.f32 %v147_v29 }
 0x112   :  { %vm99_vm6 = vmor %vm97_vm5, %vm98_vm4 }
 0x113   :  { %v90_v33 = vsel %vm89_vm3, %v145_v23, %v86_v30  ;;  %v93_v34 = vmul.f32 %v147_v29, %v92_v31 }
 0x114   :  { %v101_v35 = vmul.f32 %v90_v33, %v62_v10 }
 0x115   :  { %v94_v37 = vmul.f32 0.5, %v93_v34 }
 0x116   :  { %v107_v38 = vmul.f32 %v142_v32, %v101_v35 }
 0x117   :  { %v95_v39 = vsub.f32 1.5, %v94_v37 }
 0x118   :  { %v113_v40 = vadd.f32 %v143_v36, %v107_v38 }
 0x119   :  { %v96_v41 = vmul.f32 %v147_v29, %v95_v39 }
 0x11a   :  { %115 = vst [vmem:[#allocation7] sm:$0xff] %v113_v40 }
 0x11b   :  { %v100_v42 = vsel %vm99_vm6, %v147_v29, %v96_v41 }
 0x11c   :  { %v102_v43 = vmul.f32 %v100_v42, %v63_v15 }
 0x11e   :  { %v108_v44 = vmul.f32 %v142_v32, %v102_v43 }
 0x120   :  { %v114_v45 = vadd.f32 %v143_v36, %v108_v44 }
 0x122   :  { %116 = vst [vmem:[#allocation7 + $0x8] sm:$0xff] %v114_v45 }
 0x123   :  { %129 = dma.vmem_to_hbm [thread:$0]  %s122_s2, 256, %s124_s6, [#allocation4], %s227_s23, %s227_s23, %s228_s24  }
 0x124   :  { %224 = dma.done.wait [#allocation4], 256  }
 0x125   :  { %225 = vsyncadd [#allocation4], 4294967040 }
 0x126   :  { %134 = vsyncpa [#allocation3], 1 }
 0x127   :  { %135 = vsyncpa [#allocation6], 1 }
 0x128   :  { %136 = vsyncpa [#allocation4], 1 }

</bundles_post_ra>
